<compile_context>
chip_gen: v5e
topology: v5e:2x2
jax: 0.10.0
libtpu: 0.0.40
codegen_flags: <defaults>
</compile_context>

<pallas_src>
import functools

import jax
import jax.numpy as jnp
from jax.experimental import pallas as pl
from jax.experimental.pallas import tpu as pltpu  # noqa: F401  (TPU backend)

_EPS = 1e-5  # nn.LayerNorm default


# --------------------------------------------------------------------------
# Kernel: full AttentionBlock forward, one invocation, everything in VMEM.
# Row layout: activations are (batch*seq, feature); weights are (in, out),
# biases (1, out), so y = x @ W + b (== torch x @ W.T + b with W^T stored).
# --------------------------------------------------------------------------
def _attention_block_kernel(x2_ref, xf2_ref, wq_ref, bq_ref, wkv_ref, bkv_ref,
                            wo_ref, bo_ref, nmask_ref, pmat_ref, g_ref, b_ref,
                            out_ref, *, num_heads):
    f32 = jnp.float32
    x2 = x2_ref[...].astype(f32)        # (B*Lt, Dt)
    xf2 = xf2_ref[...].astype(f32)      # (B*Lf, Df)
    latent = wq_ref.shape[1]
    d = latent // num_heads             # per-head dim (== d_in in the torch code)

    # --- TokensToQKV: one matmul for Q, one for fused K|V.
    # 1/d_in scale already folded into wq/bq on the host.
    q = jnp.dot(x2, wq_ref[...], preferred_element_type=f32) + bq_ref[...]      # (B*Lt, latent)
    kv = jnp.dot(xf2, wkv_ref[...], preferred_element_type=f32) + bkv_ref[...]  # (B*Lf, 2*latent)

    # --- SplitHeads + Attention.  Scores for ALL batches are computed in one
    # NT matmul per head; the additive block-diagonal mask (0 within a batch,
    # -1e30 across batches) keeps the softmax per-batch.
    nmask = nmask_ref[...]              # (B*Lt, B*Lf)
    head_outs = []
    for h in range(num_heads):          # static, tiny loop (num_heads = 2)
        sl = slice(h * d, (h + 1) * d)
        qh = q[:, sl]                                        # (B*Lt, d)
        kh = kv[:, sl]                                       # (B*Lf, d)
        vh = kv[:, latent + h * d: latent + (h + 1) * d]     # (B*Lf, d)
        s = jax.lax.dot_general(qh, kh, (((1,), (1,)), ((), ())),
                                preferred_element_type=f32) + nmask  # (B*Lt, B*Lf)
        s = s - jnp.max(s, axis=-1, keepdims=True)
        e = jnp.exp(s)
        attn = e / jnp.sum(e, axis=-1, keepdims=True)        # exact divide
        head_outs.append(jnp.dot(attn, vh, preferred_element_type=f32))  # (B*Lt, d)

    o_cat = head_outs[0] if num_heads == 1 else jnp.concatenate(head_outs, axis=-1)
    proj = jnp.dot(o_cat, wo_ref[...], preferred_element_type=f32) + bo_ref[...]  # (B*Lt, Dt)

    # --- SkipLayerNorm over each batch's (Lt, Dt) slab.  pmat is the
    # (B*Lt, B*Lt) block-averaging matrix (1/(Lt*Dt) within a batch), so one
    # small matmul + a lane reduction gives per-row mean/var with no reshapes.
    y = x2 + proj
    pmat = pmat_ref[...]
    mean = jnp.sum(jnp.dot(pmat, y, preferred_element_type=f32),
                   axis=-1, keepdims=True)                   # (B*Lt, 1)
    yc = y - mean
    var = jnp.sum(jnp.dot(pmat, yc * yc, preferred_element_type=f32),
                  axis=-1, keepdims=True)                    # (B*Lt, 1)
    yn = yc * jax.lax.rsqrt(var + _EPS)
    out_ref[...] = (yn * g_ref[...] + b_ref[...]).astype(out_ref.dtype)


# --------------------------------------------------------------------------
# Wrapper: host-side weight/layout prep + single pallas_call (no grid).
# --------------------------------------------------------------------------
def attention_block(x_to, x_from, params, num_heads):
    B, Lt, Dt = x_to.shape
    _, Lf, Df = x_from.shape
    latent = params["wq"].shape[1]
    d = latent // num_heads

    # Host-side prep (all tiny, plain XLA ops outside the kernel):
    x2 = x_to.reshape(B * Lt, Dt)
    xf2 = x_from.reshape(B * Lf, Df)
    inv_d = 1.0 / float(d)
    wq = params["wq"] * inv_d                  # fold the 1/d_in score scale into Q
    bq = params["bq"] * inv_d
    wkv = jnp.concatenate([params["wk"], params["wv"]], axis=1)   # (Df, 2*latent)
    bkv = jnp.concatenate([params["bk"], params["bv"]], axis=1)   # (1, 2*latent)
    row_b = jnp.arange(B * Lt) // Lt
    col_b = jnp.arange(B * Lf) // Lf
    neg_mask = jnp.where(row_b[:, None] == col_b[None, :], 0.0, -1e30).astype(jnp.float32)
    pmat = jnp.where(row_b[:, None] == row_b[None, :],
                     1.0 / float(Lt * Dt), 0.0).astype(jnp.float32)
    gamma_rows = jnp.tile(params["gamma"], (B, 1))                # (B*Lt, Dt)
    beta_rows = jnp.tile(params["beta"], (B, 1))                  # (B*Lt, Dt)

    kernel = functools.partial(_attention_block_kernel, num_heads=num_heads)
    out2 = pl.pallas_call(
        kernel,
        out_shape=jax.ShapeDtypeStruct((B * Lt, Dt), x_to.dtype),
    )(x2, xf2, wq, bq, wkv, bkv, params["wo"], params["bo"],
      neg_mask, pmat, gamma_rows, beta_rows)
    return out2.reshape(B, Lt, Dt)


# --------------------------------------------------------------------------
# Pure-JAX reference (mirrors the PyTorch module) for a correctness check.
# --------------------------------------------------------------------------
def attention_block_ref(x_to, x_from, p, num_heads):
    q = x_to @ p["wq"] + p["bq"]
    k = x_from @ p["wk"] + p["bk"]
    v = x_from @ p["wv"] + p["bv"]
    B, Lt, latent = q.shape
    Lf = k.shape[1]
    d = latent // num_heads
    qh = q.reshape(B, Lt, num_heads, d).transpose(0, 2, 1, 3)
    kh = k.reshape(B, Lf, num_heads, d).transpose(0, 2, 1, 3)
    vh = v.reshape(B, Lf, num_heads, d).transpose(0, 2, 1, 3)
    attn = jax.nn.softmax(qh @ jnp.swapaxes(kh, -1, -2) / d, axis=-1)  # scale is 1/d_in
    o = (attn @ vh).transpose(0, 2, 1, 3).reshape(B, Lt, latent)
    o = o @ p["wo"] + p["bo"]
    y = x_to + o
    mean = jnp.mean(y, axis=(1, 2), keepdims=True)
    var = jnp.mean((y - mean) ** 2, axis=(1, 2), keepdims=True)
    return (y - mean) / jnp.sqrt(var + _EPS) * p["gamma"] + p["beta"]


# --------------------------------------------------------------------------
# Deterministic parameter init (PyTorch-style uniform(-1/sqrt(fan_in)))
# --------------------------------------------------------------------------
def init_linear(key, in_dim, out_dim):
    k1, k2 = jax.random.split(key)
    bound = 1.0 / (in_dim ** 0.5)
    w = jax.random.uniform(k1, (in_dim, out_dim), jnp.float32, -bound, bound)
    b = jax.random.uniform(k2, (1, out_dim), jnp.float32, -bound, bound)
    return w, b


def init_attention_block(key, to_dim, to_len, from_dim, latent_dim):
    ks = jax.random.split(key, 4)
    wq, bq = init_linear(ks[0], to_dim, latent_dim)
    wk, bk = init_linear(ks[1], from_dim, latent_dim)
    wv, bv = init_linear(ks[2], from_dim, latent_dim)
    wo, bo = init_linear(ks[3], latent_dim, to_dim)
    return dict(wq=wq, bq=bq, wk=wk, bk=bk, wv=wv, bv=bv, wo=wo, bo=bo,
                gamma=jnp.ones((to_len, to_dim), jnp.float32),
                beta=jnp.zeros((to_len, to_dim), jnp.float32))


# --------------------------------------------------------------------------
if __name__ == "__main__":
    batch_size = 8
    latent_dim = 10
    to_dim = 5
    to_len = 3
    num_heads = 2
    from_dim = 6
    from_len = 10   # X_from sequence length (not pinned by the module spec)

    key = jax.random.PRNGKey(0)
    k_to, k_from, k_par = jax.random.split(key, 3)
    X_to = jax.random.normal(k_to, (batch_size, to_len, to_dim), jnp.float32)
    X_from = jax.random.normal(k_from, (batch_size, from_len, from_dim), jnp.float32)
    params = init_attention_block(k_par, to_dim, to_len, from_dim, latent_dim)

    fwd = jax.jit(functools.partial(attention_block, num_heads=num_heads))
    out = jax.block_until_ready(fwd(X_to, X_from, params))

    assert out.shape == (batch_size, to_len, to_dim), out.shape
    assert bool(jnp.all(jnp.isfinite(out)))

    ref = attention_block_ref(X_to, X_from, params, num_heads)
    max_err = float(jnp.max(jnp.abs(out - ref)))
    # Tolerance covers default (non-HIGHEST) f32 matmul precision on both the
    # MXU path in the kernel and the XLA reference; approx reciprocal removed.
    assert max_err < 2e-2, max_err
    print("KERNEL_OK")
</pallas_src>

<mosaic_0001>
module attributes {stable_mosaic.version = 11 : i64} {
  func.func @_attention_block_kernel(%arg0: memref<24x5xf32, #tpu.memory_space<vmem>>, %arg1: memref<80x6xf32, #tpu.memory_space<vmem>>, %arg2: memref<5x10xf32, #tpu.memory_space<vmem>>, %arg3: memref<1x10xf32, #tpu.memory_space<vmem>>, %arg4: memref<6x20xf32, #tpu.memory_space<vmem>>, %arg5: memref<1x20xf32, #tpu.memory_space<vmem>>, %arg6: memref<10x5xf32, #tpu.memory_space<vmem>>, %arg7: memref<1x5xf32, #tpu.memory_space<vmem>>, %arg8: memref<24x80xf32, #tpu.memory_space<vmem>>, %arg9: memref<24x24xf32, #tpu.memory_space<vmem>>, %arg10: memref<24x5xf32, #tpu.memory_space<vmem>>, %arg11: memref<24x5xf32, #tpu.memory_space<vmem>>, %arg12: memref<24x5xf32, #tpu.memory_space<vmem>>) attributes {dimension_semantics = [], scalar_prefetch = 0 : i64, scratch_operands = 0 : i64, tpu.core_type = #tpu.core_type<tc>} {
    %c0 = arith.constant 0 : index
    %c0_0 = arith.constant 0 : index
    %0 = vector.load %arg0[%c0, %c0_0] : memref<24x5xf32, #tpu.memory_space<vmem>>, vector<24x5xf32>
    %c0_1 = arith.constant 0 : index
    %c0_2 = arith.constant 0 : index
    %1 = vector.load %arg1[%c0_1, %c0_2] : memref<80x6xf32, #tpu.memory_space<vmem>>, vector<80x6xf32>
    %c0_3 = arith.constant 0 : index
    %c0_4 = arith.constant 0 : index
    %2 = vector.load %arg2[%c0_3, %c0_4] : memref<5x10xf32, #tpu.memory_space<vmem>>, vector<5x10xf32>
    %cst = arith.constant dense<0.000000e+00> : vector<24x10xf32>
    %3 = tpu.matmul %0, %2, %cst {dimension_numbers = #tpu.dot_dimension_numbers<[1], [0], [0], [1], [0, 0, 1, 1], [], []>} : vector<24x5xf32>, vector<5x10xf32>, vector<24x10xf32> -> vector<24x10xf32>
    %c0_5 = arith.constant 0 : index
    %c0_6 = arith.constant 0 : index
    %4 = vector.load %arg3[%c0_5, %c0_6] : memref<1x10xf32, #tpu.memory_space<vmem>>, vector<1x10xf32>
    %5 = vector.broadcast %4 : vector<1x10xf32> to vector<24x10xf32>
    %6 = arith.addf %3, %5 : vector<24x10xf32>
    %c0_7 = arith.constant 0 : index
    %c0_8 = arith.constant 0 : index
    %7 = vector.load %arg4[%c0_7, %c0_8] : memref<6x20xf32, #tpu.memory_space<vmem>>, vector<6x20xf32>
    %cst_9 = arith.constant dense<0.000000e+00> : vector<80x20xf32>
    %8 = tpu.matmul %1, %7, %cst_9 {dimension_numbers = #tpu.dot_dimension_numbers<[1], [0], [0], [1], [0, 0, 1, 1], [], []>} : vector<80x6xf32>, vector<6x20xf32>, vector<80x20xf32> -> vector<80x20xf32>
    %c0_10 = arith.constant 0 : index
    %c0_11 = arith.constant 0 : index
    %9 = vector.load %arg5[%c0_10, %c0_11] : memref<1x20xf32, #tpu.memory_space<vmem>>, vector<1x20xf32>
    %10 = vector.broadcast %9 : vector<1x20xf32> to vector<80x20xf32>
    %11 = arith.addf %8, %10 : vector<80x20xf32>
    %c0_12 = arith.constant 0 : index
    %c0_13 = arith.constant 0 : index
    %12 = vector.load %arg8[%c0_12, %c0_13] : memref<24x80xf32, #tpu.memory_space<vmem>>, vector<24x80xf32>
    %13 = vector.extract_strided_slice %6 {offsets = [0, 0], sizes = [24, 5], strides = [1, 1]} : vector<24x10xf32> to vector<24x5xf32>
    %14 = vector.extract_strided_slice %11 {offsets = [0, 0], sizes = [80, 5], strides = [1, 1]} : vector<80x20xf32> to vector<80x5xf32>
    %15 = vector.extract_strided_slice %11 {offsets = [0, 10], sizes = [80, 5], strides = [1, 1]} : vector<80x20xf32> to vector<80x5xf32>
    %cst_14 = arith.constant dense<0.000000e+00> : vector<24x80xf32>
    %16 = tpu.matmul %13, %14, %cst_14 {dimension_numbers = #tpu.dot_dimension_numbers<[1], [1], [0], [0], [0, 0, 1, 0], [], []>} : vector<24x5xf32>, vector<80x5xf32>, vector<24x80xf32> -> vector<24x80xf32>
    %17 = arith.addf %16, %12 : vector<24x80xf32>
    %cst_15 = arith.constant dense<0xFF800000> : vector<24xf32>
    %18 = vector.multi_reduction <maximumf>, %17, %cst_15 [1] : vector<24x80xf32> to vector<24xf32>
    %19 = vector.shape_cast %18 : vector<24xf32> to vector<24x1xf32>
    %20 = vector.broadcast %19 : vector<24x1xf32> to vector<24x80xf32>
    %21 = arith.subf %17, %20 : vector<24x80xf32>
    %22 = math.exp %21 : vector<24x80xf32>
    %cst_16 = arith.constant dense<0.000000e+00> : vector<24xf32>
    %23 = vector.multi_reduction <add>, %22, %cst_16 [1] : vector<24x80xf32> to vector<24xf32>
    %24 = vector.shape_cast %23 : vector<24xf32> to vector<24x1xf32>
    %25 = vector.broadcast %24 : vector<24x1xf32> to vector<24x80xf32>
    %26 = arith.divf %22, %25 : vector<24x80xf32>
    %cst_17 = arith.constant dense<0.000000e+00> : vector<24x5xf32>
    %27 = tpu.matmul %26, %15, %cst_17 {dimension_numbers = #tpu.dot_dimension_numbers<[1], [0], [0], [1], [0, 0, 1, 1], [], []>} : vector<24x80xf32>, vector<80x5xf32>, vector<24x5xf32> -> vector<24x5xf32>
    %28 = vector.extract_strided_slice %6 {offsets = [0, 5], sizes = [24, 5], strides = [1, 1]} : vector<24x10xf32> to vector<24x5xf32>
    %29 = vector.extract_strided_slice %11 {offsets = [0, 5], sizes = [80, 5], strides = [1, 1]} : vector<80x20xf32> to vector<80x5xf32>
    %30 = vector.extract_strided_slice %11 {offsets = [0, 15], sizes = [80, 5], strides = [1, 1]} : vector<80x20xf32> to vector<80x5xf32>
    %cst_18 = arith.constant dense<0.000000e+00> : vector<24x80xf32>
    %31 = tpu.matmul %28, %29, %cst_18 {dimension_numbers = #tpu.dot_dimension_numbers<[1], [1], [0], [0], [0, 0, 1, 0], [], []>} : vector<24x5xf32>, vector<80x5xf32>, vector<24x80xf32> -> vector<24x80xf32>
    %32 = arith.addf %31, %12 : vector<24x80xf32>
    %cst_19 = arith.constant dense<0xFF800000> : vector<24xf32>
    %33 = vector.multi_reduction <maximumf>, %32, %cst_19 [1] : vector<24x80xf32> to vector<24xf32>
    %34 = vector.shape_cast %33 : vector<24xf32> to vector<24x1xf32>
    %35 = vector.broadcast %34 : vector<24x1xf32> to vector<24x80xf32>
    %36 = arith.subf %32, %35 : vector<24x80xf32>
    %37 = math.exp %36 : vector<24x80xf32>
    %cst_20 = arith.constant dense<0.000000e+00> : vector<24xf32>
    %38 = vector.multi_reduction <add>, %37, %cst_20 [1] : vector<24x80xf32> to vector<24xf32>
    %39 = vector.shape_cast %38 : vector<24xf32> to vector<24x1xf32>
    %40 = vector.broadcast %39 : vector<24x1xf32> to vector<24x80xf32>
    %41 = arith.divf %37, %40 : vector<24x80xf32>
    %cst_21 = arith.constant dense<0.000000e+00> : vector<24x5xf32>
    %42 = tpu.matmul %41, %30, %cst_21 {dimension_numbers = #tpu.dot_dimension_numbers<[1], [0], [0], [1], [0, 0, 1, 1], [], []>} : vector<24x80xf32>, vector<80x5xf32>, vector<24x5xf32> -> vector<24x5xf32>
    %43 = tpu.concatenate %27, %42 in 1 : vector<24x5xf32>, vector<24x5xf32> -> vector<24x10xf32>
    %c0_22 = arith.constant 0 : index
    %c0_23 = arith.constant 0 : index
    %44 = vector.load %arg6[%c0_22, %c0_23] : memref<10x5xf32, #tpu.memory_space<vmem>>, vector<10x5xf32>
    %cst_24 = arith.constant dense<0.000000e+00> : vector<24x5xf32>
    %45 = tpu.matmul %43, %44, %cst_24 {dimension_numbers = #tpu.dot_dimension_numbers<[1], [0], [0], [1], [0, 0, 1, 1], [], []>} : vector<24x10xf32>, vector<10x5xf32>, vector<24x5xf32> -> vector<24x5xf32>
    %c0_25 = arith.constant 0 : index
    %c0_26 = arith.constant 0 : index
    %46 = vector.load %arg7[%c0_25, %c0_26] : memref<1x5xf32, #tpu.memory_space<vmem>>, vector<1x5xf32>
    %47 = vector.broadcast %46 : vector<1x5xf32> to vector<24x5xf32>
    %48 = arith.addf %45, %47 : vector<24x5xf32>
    %49 = arith.addf %0, %48 : vector<24x5xf32>
    %c0_27 = arith.constant 0 : index
    %c0_28 = arith.constant 0 : index
    %50 = vector.load %arg9[%c0_27, %c0_28] : memref<24x24xf32, #tpu.memory_space<vmem>>, vector<24x24xf32>
    %cst_29 = arith.constant dense<0.000000e+00> : vector<24x5xf32>
    %51 = tpu.matmul %50, %49, %cst_29 {dimension_numbers = #tpu.dot_dimension_numbers<[1], [0], [0], [1], [0, 0, 1, 1], [], []>} : vector<24x24xf32>, vector<24x5xf32>, vector<24x5xf32> -> vector<24x5xf32>
    %cst_30 = arith.constant dense<0.000000e+00> : vector<24xf32>
    %52 = vector.multi_reduction <add>, %51, %cst_30 [1] : vector<24x5xf32> to vector<24xf32>
    %53 = vector.shape_cast %52 : vector<24xf32> to vector<24x1xf32>
    %54 = vector.broadcast %53 : vector<24x1xf32> to vector<24x5xf32>
    %55 = arith.subf %49, %54 : vector<24x5xf32>
    %56 = arith.mulf %55, %55 : vector<24x5xf32>
    %cst_31 = arith.constant dense<0.000000e+00> : vector<24x5xf32>
    %57 = tpu.matmul %50, %56, %cst_31 {dimension_numbers = #tpu.dot_dimension_numbers<[1], [0], [0], [1], [0, 0, 1, 1], [], []>} : vector<24x24xf32>, vector<24x5xf32>, vector<24x5xf32> -> vector<24x5xf32>
    %cst_32 = arith.constant dense<0.000000e+00> : vector<24xf32>
    %58 = vector.multi_reduction <add>, %57, %cst_32 [1] : vector<24x5xf32> to vector<24xf32>
    %59 = vector.shape_cast %58 : vector<24xf32> to vector<24x1xf32>
    %cst_33 = arith.constant 9.99999974E-6 : f32
    %60 = vector.broadcast %cst_33 : f32 to vector<24x1xf32>
    %61 = arith.addf %59, %60 : vector<24x1xf32>
    %62 = math.rsqrt %61 : vector<24x1xf32>
    %63 = vector.broadcast %62 : vector<24x1xf32> to vector<24x5xf32>
    %64 = arith.mulf %55, %63 : vector<24x5xf32>
    %c0_34 = arith.constant 0 : index
    %c0_35 = arith.constant 0 : index
    %65 = vector.load %arg10[%c0_34, %c0_35] : memref<24x5xf32, #tpu.memory_space<vmem>>, vector<24x5xf32>
    %66 = arith.mulf %64, %65 : vector<24x5xf32>
    %c0_36 = arith.constant 0 : index
    %c0_37 = arith.constant 0 : index
    %67 = vector.load %arg11[%c0_36, %c0_37] : memref<24x5xf32, #tpu.memory_space<vmem>>, vector<24x5xf32>
    %68 = arith.addf %66, %67 : vector<24x5xf32>
    %c0_38 = arith.constant 0 : index
    %c0_39 = arith.constant 0 : index
    %69 = vector.load %arg12[%c0_38, %c0_39] : memref<24x5xf32, #tpu.memory_space<vmem>>, vector<24x5xf32>
    tpu.vector_store %arg12[%c0_38, %c0_39], %68 {strides = array<i32>} : memref<24x5xf32, #tpu.memory_space<vmem>>, vector<24x5xf32>,
    return
  }
}

</mosaic_0001>

<bundles_post_ra>
// kernel: tile.14
= control target key start
LH: loop header
LB: loop body
LE: loop exit
PB: predicated region body
PF: predicated region fallthrough
CT: control target
= control target key end

     0   :  { %vm5_vm0 = vcmask 1044484   ;;  %s101_s14 = smov 21   ;;  %s102_s15 = smov 15   ;;  %vm7_vm1 = vcmask 23552   ;;  %vm17_vm2 = vcmask 195752   ;;  %vm27_vm3 = vcmask 171152   ;;  %s198_s0 = inlined_call_operand.vmem [shape: f32[8,3,5], index: 0, kind: input, shape index: {}]   ;;  %s199_s1 = inlined_call_operand.vmem [shape: f32[24,5], index: 1, kind: output, shape index: {}]  }
   0x1   :  { %v80_v0 = vld [vmem:[%s198_s0 + $0x7] ss:$8 sm:$0xf]   ;;  %v84_v3 = vld [vmem:[%s198_s0 + $0x5] ss:$8 sm:$0xf]  }
   0x2   :  { %v81_v1 = vld [vmem:[%s198_s0 + $0x23] sm:$0x10]   ;;  %v85_v4 = vld [vmem:[%s198_s0 + $0x21] sm:$0x10]   ;;  %v83_v7 = vld [vmem:[%s198_s0 + $0x22] sm:$0x10]  }
   0x3   :  { %v14_v2 = vsel %vm5_vm0, %v81_v1, %v80_v0  ;;  %v34_v5 = vsel %vm5_vm0, %v85_v4, %v84_v3  ;;  %v82_v6 = vld [vmem:[%s198_s0 + $0x6] ss:$8 sm:$0xf]   ;;  %v86_v8 = vld [vmem:[%s198_s0 + $0x4] ss:$8 sm:$0xf]  }
   0x4   :  { %15 = vrot.lane.b32.xlu0 %v14_v2, %s101_s14  ;;  %35 = vrot.lane.b32.xlu1 %v34_v5, %s102_s15  ;;  %v87_v9 = vld [vmem:[%s198_s0 + $0x20] sm:$0x10]   ;;  %v88_v10 = vld [vmem:[%s198_s0 + $0x3] ss:$8 sm:$0xf]   ;;  %v24_v13 = vsel %vm5_vm0, %v83_v7, %v82_v6  ;;  %s103_s28 = smov 9  }
   0x5   :  { %v89_v11 = vld [vmem:[%s198_s0 + $0x1f] sm:$0x10]   ;;  %v44_v14 = vsel %vm5_vm0, %v87_v9, %v86_v8  ;;  %v90_v15 = vld [vmem:[%s198_s0 + $0x2] ss:$8 sm:$0xf]   ;;  %s104_s4 = smov 18  }
   0x6   :  { %v54_v12 = vsel %vm5_vm0, %v89_v11, %v88_v10  ;;  %v91_v16 = vld [vmem:[%s198_s0 + $0x1e] sm:$0x10]   ;;  %s105_s5 = smov 12   ;;  %v92_v17 = vld [vmem:[%s198_s0 + $0x1] ss:$8 sm:$0xf]  }
   0x7   :  { %55 = vrot.lane.b32.xlu2 %v54_v12, %s103_s28  ;;  %v93_v18 = vld [vmem:[%s198_s0 + $0x1d] sm:$0x10]   ;;  %v64_v19 = vsel %vm5_vm0, %v91_v16, %v90_v15  ;;  %s106_s10 = smov 6   ;;  %s107_s11 = smov 3   ;;  %v79_v22 = vld [vmem:[%s198_s0 + $0x1c] sm:$0x10]  }
   0x8   :  { %v74_v20 = vsel %vm5_vm0, %v93_v18, %v92_v17  ;;  %v2_v21 = vld [vmem:[%s198_s0] ss:$8 sm:$0xf]   ;;  %vm37_vm4 = vcmask 146552   ;;  %vm47_vm5 = vcmask 121952   ;;  %vm57_vm6 = vcmask 97352  }
   0x9   :  { %v6_v23 = vsel %vm5_vm0, %v79_v22, %v2_v21  ;;  %vm67_vm7 = vcmask 72752   ;;  %vm77_vm8 = vcmask 48152  }
   0xa   :  { %8 = vst.msk [vmem:[%s199_s1] sm:$0x1f] %vm7_vm1, %v6_v23  }
   0xc   :  { %25 = vrot.lane.b32.xlu0 %v24_v13, %s104_s4  ;;  %45 = vrot.lane.b32.xlu1 %v44_v14, %s105_s5 }
   0xf   :  { %65 = vrot.lane.b32.xlu2 %v64_v19, %s106_s10 }
  0x14   :  { %75 = vrot.lane.b32.xlu0 %v74_v20, %s107_s11 }
  0x61   :  { %v56_v24 = vpop.permute.xlu2 %55  }
  0x69   :  { %v66_v25 = vpop.permute.xlu2 %65  }
  0x76   :  { %v16_v26 = vpop.permute.xlu0 %15   ;;  %v36_v27 = vpop.permute.xlu1 %35  }
  0x77   :  { %18 = vst.msk [vmem:[%s199_s1] sm:$0x1f] %vm17_vm2, %v16_v26  }
  0x7e   :  { %v26_v28 = vpop.permute.xlu0 %25   ;;  %v46_v29 = vpop.permute.xlu1 %45  }
  0x7f   :  { %28 = vst.msk [vmem:[%s199_s1] sm:$0x1f] %vm27_vm3, %v26_v28  }
  0x80   :  { %38 = vst.msk [vmem:[%s199_s1] sm:$0x1f] %vm37_vm4, %v36_v27  }
  0x81   :  { %48 = vst.msk [vmem:[%s199_s1] sm:$0x1f] %vm47_vm5, %v46_v29  }
  0x82   :  { %58 = vst.msk [vmem:[%s199_s1] sm:$0x1f] %vm57_vm6, %v56_v24  }
  0x83   :  { %68 = vst.msk [vmem:[%s199_s1] sm:$0x1f] %vm67_vm7, %v66_v25  }
  0x86   :  { %v76_v30 = vpop.permute.xlu0 %75  }
  0x87   :  { %78 = vst.msk [vmem:[%s199_s1] sm:$0x1f] %vm77_vm8, %v76_v30  }

// kernel: attention_block.1
= control target key start
LH: loop header
LB: loop body
LE: loop exit
PB: predicated region body
PF: predicated region fallthrough
CT: control target
= control target key end

     0   :  { %vm135_vm0 = vcmask 1045504   ;;  %vm104_vm1 = vcmask 48128   ;;  %vm69_vm2 = vcmask 1044480   ;;  %vm59_vm3 = vcmask 39936   ;;  %s962_s21 = smov 5   ;;  %s1317_s4 = inlined_call_operand.vmem [shape: f32[6,20], index: 4, kind: input, shape index: {}]   ;;  %s1318_s1 = inlined_call_operand.vmem [shape: f32[80,6], index: 1, kind: input, shape index: {}]   ;;  %s1319_s5 = inlined_call_operand.vmem [shape: f32[1,20], index: 5, kind: input, shape index: {}]   ;;  %s1320_s2 = inlined_call_operand.vmem [shape: f32[5,10], index: 2, kind: input, shape index: {}]   ;;  %s1321_s0 = inlined_call_operand.vmem [shape: f32[24,5], index: 0, kind: input, shape index: {}]   ;;  %s1322_s3 = inlined_call_operand.vmem [shape: f32[1,10], index: 3, kind: input, shape index: {}]   ;;  %s1323_s8 = inlined_call_operand.vmem [shape: f32[24,80], index: 8, kind: input, shape index: {}]   ;;  %s1324_s6 = inlined_call_operand.vmem [shape: f32[10,5], index: 6, kind: input, shape index: {}]   ;;  %s1325_s7 = inlined_call_operand.vmem [shape: f32[1,5], index: 7, kind: input, shape index: {}]   ;;  %s1326_s9 = inlined_call_operand.vmem [shape: f32[24,24], index: 9, kind: input, shape index: {}]   ;;  %s1327_s10 = inlined_call_operand.vmem [shape: f32[24,5], index: 10, kind: input, shape index: {}]   ;;  %s1328_s11 = inlined_call_operand.vmem [shape: f32[24,5], index: 11, kind: input, shape index: {}]   ;;  %s1329_s12 = inlined_call_operand.vmem [shape: f32[24,5], index: 12, kind: output, shape index: {}]  }
   0x1   :  { %v99_v0 = vld [vmem:[%s1317_s4] sm:$0x3f]  ;;  %v45_v2 = vld [vmem:[%s1318_s1 + $0x8] sm:$0xff]  ;;  %v46_v3 = vld [vmem:[%s1318_s1 + $0x10] sm:$0xff]  ;;  %vm254_vm4 = vcmask 654336  }
   0x2   :  { %v44_v1 = vld [vmem:[%s1318_s1] sm:$0xff]  ;;  %819 = vmatpush.msk.msra.mxu1 %vm135_vm0, %v99_v0  ;;  %v47_v6 = vld [vmem:[%s1318_s1 + $0x18] sm:$0xff]  ;;  %v1060_v7 = vld [vmem:[%s1321_s0 + $0x8] sm:$0xff] }
   0x3   :  { %820 = vmatmul.msk.f32.vlgmr.msra.gmra.mxu1 %vm104_vm1, %v44_v1  ;;  %v54_v4 = vld [vmem:[%s1320_s2] sm:$0x1f]  ;;  %v49_v9 = vld [vmem:[%s1318_s1 + $0x28] sm:$0xff]  ;;  %v50_v10 = vld [vmem:[%s1318_s1 + $0x30] sm:$0xff] }
   0x4   :  { %v1049_v5 = vld [vmem:[%s1321_s0] sm:$0xff]  ;;  %815 = vmatpush.msk.msra.mxu0 %vm69_vm2, %v54_v4  ;;  %v51_v11 = vld [vmem:[%s1318_s1 + $0x38] sm:$0xff]  ;;  %v53_v13 = vld [vmem:[%s1318_s1 + $0x48] sm:$0xff] }
   0x5   :  { %816 = vmatmul.msk.f32.vlgmr.msra.gmra.mxu0 %vm59_vm3, %v1049_v5  ;;  %v48_v8 = vld [vmem:[%s1318_s1 + $0x20] sm:$0xff]  ;;  %v1091_v14 = vld [vmem:[%s1321_s0 + $0x10] sm:$0xff]  ;;  %s959_s0 = smov 123  }
   0x6   :  { %v52_v12 = vld [vmem:[%s1318_s1 + $0x40] sm:$0xff] }
   0x7   :  { %v926_v15 = vld [vmem:[%s1319_s5] ss:$0 sm:$0xff] }
   0x8   :  { %v927_v33 = vld [vmem:[%s1322_s3] ss:$0 sm:$0xff]  ;;  %s960_s3 = smov 118  }
   0x9   :  { %v186_v0 = vld [vmem:[%s1323_s8] sm:$0xff] }
   0xb   :  { %821 = vmatmul.msk.f32.gmra.mxu1 %vm104_vm1, %v45_v2 }
   0xd   :  { %817 = vmatmul.msk.f32.gmra.mxu0 %vm59_vm3, %v1060_v7 }
  0x13   :  { %822 = vmatmul.msk.f32.gmra.mxu1 %vm104_vm1, %v46_v3 }
  0x15   :  { %818 = vmatmul.msk.f32.gmra.mxu0 %vm59_vm3, %v1091_v14 }
  0x1b   :  { %823 = vmatmul.msk.f32.gmra.mxu1 %vm104_vm1, %v47_v6  ;;  %v187_v6 = vld [vmem:[%s1323_s8 + $0x8] sm:$0xff] }
  0x23   :  { %824 = vmatmul.msk.f32.gmra.mxu1 %vm104_vm1, %v48_v8 }
  0x2b   :  { %825 = vmatmul.msk.f32.gmra.mxu1 %vm104_vm1, %v49_v9 }
  0x33   :  { %826 = vmatmul.msk.f32.gmra.mxu1 %vm104_vm1, %v50_v10 }
  0x3b   :  { %827 = vmatmul.msk.f32.gmra.mxu1 %vm104_vm1, %v51_v11  ;;  %v188_v11 = vld [vmem:[%s1323_s8 + $0x10] sm:$0xff]  ;;  %s961_s8 = smov 113  }
  0x43   :  { %828 = vmatmul.msk.f32.gmra.mxu1 %vm104_vm1, %v52_v12 }
  0x4b   :  { %829 = vmatmul.msk.f32.gmra.mxu1 %vm104_vm1, %v53_v13 }
  0x80   :  { %v156_v16 = vpop.f32.mrf.mxu1 }
  0x81   :  { %v1098_v17 = vadd.f32 %v926_v15, %v156_v16 }
  0x82   :  { %v90_v28 = vpop.f32.mrf.mxu0 }
  0x83   :  { %v91_v43 = vadd.f32 %v927_v33, %v90_v28 }
  0x88   :  { %v159_v18 = vpop.f32.mrf.mxu1 }
  0x89   :  { %v1106_v30 = vadd.f32 %v926_v15, %v159_v18 }
  0x8a   :  { %v93_v35 = vpop.f32.mrf.mxu0 }
  0x8b   :  { %v94_v36 = vadd.f32 %v927_v33, %v93_v35  ;;  %v1186_v18 = vpack.i.bf16 %v1098_v17, %v1106_v30 }
  0x90   :  { %v162_v19 = vpop.f32.mrf.mxu1 }
  0x91   :  { %v1118_v41 = vadd.f32 %v926_v15, %v162_v19 }
  0x92   :  { %v96_v44 = vpop.f32.mrf.mxu0 }
  0x93   :  { %v97_v45 = vadd.f32 %v927_v33, %v96_v44 }
  0x98   :  { %v165_v20 = vpop.f32.mrf.mxu1 }
  0x99   :  { %v1100_v21 = vadd.f32 %v926_v15, %v165_v20 }
  0x9b   :  { %v1180_v16 = vpack.i.bf16 %v1118_v41, %v1100_v21 }
  0xa0   :  { %v168_v22 = vpop.f32.mrf.mxu1 }
  0xa1   :  { %v169_v24 = vadd.f32 %v926_v15, %v168_v22 }
  0xa8   :  { %v171_v23 = vpop.f32.mrf.mxu1 }
  0xa9   :  { %v172_v25 = vadd.f32 %v926_v15, %v171_v23 }
  0xab   :  { %408 = vrot.lane.b32.xlu2 %v172_v25, %s959_s0  ;;  %v1103_v26 = vpack.i.bf16 %v169_v24, %v172_v25 }
  0xb0   :  { %v174_v27 = vpop.f32.mrf.mxu1 }
  0xb1   :  { %v175_v31 = vadd.f32 %v926_v15, %v174_v27 }
  0xb3   :  { %406 = vrot.lane.b32.xlu2 %v169_v24, %s959_s0 }
  0xb8   :  { %v177_v29 = vpop.f32.mrf.mxu1 }
  0xb9   :  { %v178_v32 = vadd.f32 %v926_v15, %v177_v29 }
  0xbb   :  { %412 = vrot.lane.b32.xlu1 %v178_v32, %s959_s0  ;;  %400 = vrot.lane.b32.xlu2 %v1106_v30, %s959_s0  ;;  %v1114_v34 = vpack.i.bf16 %v175_v31, %v178_v32 }
  0xc0   :  { %v180_v37 = vpop.f32.mrf.mxu1 }
  0xc1   :  { %v181_v39 = vadd.f32 %v926_v15, %v180_v37 }
  0xc3   :  { %410 = vrot.lane.b32.xlu1 %v175_v31, %s959_s0  ;;  %394 = vrot.lane.b32.xlu2 %v94_v36, %s959_s0 }
  0xc8   :  { %v183_v38 = vpop.f32.mrf.mxu1 }
  0xc9   :  { %v184_v40 = vadd.f32 %v926_v15, %v183_v38 }
  0xcb   :  { %416 = vrot.lane.b32.xlu0 %v184_v40, %s959_s0  ;;  %830 = vmatpush.xpose.msk.msra.mxu2 %vm59_vm3, %v184_v40  ;;  %v1122_v42 = vpack.i.bf16 %v181_v39, %v184_v40 }
  0xcc   :  { %402 = vrot.lane.b32.xlu1 %v1118_v41, %s959_s0  ;;  %877 = vrot.lane.b32.xlu2 %v1114_v34, %s960_s3 }
  0xcf   :  { %831 = vmatpush.xpose.msk.msra.mxu2 %vm59_vm3, %v181_v39 }
  0xd3   :  { %414 = vrot.lane.b32.xlu0 %v181_v39, %s959_s0  ;;  %832 = vmatpush.xpose.msk.msra.mxu2 %vm59_vm3, %v178_v32 }
  0xd4   :  { %392 = vrot.lane.b32.xlu1 %v91_v43, %s959_s0 }
  0xd7   :  { %833 = vmatpush.xpose.msk.msra.mxu2 %vm59_vm3, %v175_v31 }
  0xdb   :  { %834 = vmatpush.xpose.msk.msra.mxu2 %vm59_vm3, %v172_v25  ;;  %404 = vrot.lane.b32.xlu0 %v1100_v21, %s959_s0 }
  0xdc   :  { %882 = vrot.lane.b32.xlu1 %v1122_v42, %s960_s3 }
  0xdf   :  { %835 = vmatpush.xpose.msk.msra.mxu2 %vm59_vm3, %v169_v24 }
  0xe3   :  { %836 = vmatpush.xpose.msk.msra.mxu2 %vm59_vm3, %v1100_v21  ;;  %398 = vrot.lane.b32.xlu0 %v1098_v17, %s959_s0 }
  0xe7   :  { %837 = vmatpush.xpose.msk.msra.mxu2 %vm59_vm3, %v1118_v41 }
  0xeb   :  { %838 = vmatpush.xpose.msk.msra.mxu2 %vm59_vm3, %v1106_v30  ;;  %396 = vrot.lane.b32.xlu0 %v97_v45, %s959_s0 }
  0xef   :  { %839 = vmatpush.xpose.msk.msra.mxu2 %vm59_vm3, %v1098_v17 }
  0xf2   :  { %840 = vmatmul.msk.f32.vlgmr.msra.gmra.mxu2 %vm59_vm3, %v91_v43 }
  0xfa   :  { %841 = vmatmul.msk.f32.gmra.mxu2 %vm59_vm3, %v94_v36 }
 0x102   :  { %842 = vmatmul.msk.f32.gmra.mxu2 %vm59_vm3, %v97_v45 }
 0x105   :  { %v409_v46 = vpop.permute.xlu2 %408 }
 0x10d   :  { %v407_v48 = vpop.permute.xlu2 %406 }
 0x115   :  { %v401_v50 = vpop.permute.xlu2 %400 }
 0x11d   :  { %v395_v54 = vpop.permute.xlu2 %394 }
 0x126   :  { %v878_v58 = vpop.permute.xlu2 %877 }
 0x127   :  { %v879_v60 = vunpack.i.l.bf16 %v878_v58  ;;  %v880_v61 = vunpack.i.h.bf16 %v878_v58 }
 0x12d   :  { %v413_v47 = vpop.permute.xlu1 %412 }
 0x135   :  { %v411_v49 = vpop.permute.xlu1 %410 }
 0x13d   :  { %v417_v51 = vpop.permute.xlu0 %416 }
 0x13e   :  { %v403_v52 = vpop.permute.xlu1 %402  ;;  %846 = vmatpush.xpose.msk.msrb.mxu0 %vm59_vm3, %v417_v51 }
 0x145   :  { %v415_v53 = vpop.permute.xlu0 %414 }
 0x146   :  { %v393_v55 = vpop.permute.xlu1 %392  ;;  %847 = vmatpush.xpose.msk.msrb.mxu0 %vm59_vm3, %v415_v53 }
 0x14a   :  { %848 = vmatpush.xpose.msk.msrb.mxu0 %vm59_vm3, %v413_v47 }
 0x14d   :  { %v405_v62 = vpop.permute.xlu0 %404 }
 0x14e   :  { %v883_v56 = vpop.permute.xlu1 %882  ;;  %849 = vmatpush.xpose.msk.msrb.mxu0 %vm59_vm3, %v411_v49 }
 0x14f   :  { %v884_v57 = vunpack.i.l.bf16 %v883_v56  ;;  %v885_v59 = vunpack.i.h.bf16 %v883_v56 }
 0x151   :  { %372 = vmatpush.msra.mxu3 %v884_v57 }
 0x152   :  { %850 = vmatpush.xpose.msk.msrb.mxu0 %vm59_vm3, %v409_v46 }
 0x153   :  { %373 = vmatpush.msra.mxu3 %v885_v59 }
 0x155   :  { %374 = vmatpush.msra.mxu3 %v879_v60  ;;  %v399_v63 = vpop.permute.xlu0 %398 }
 0x156   :  { %851 = vmatpush.xpose.msk.msrb.mxu0 %vm59_vm3, %v407_v48 }
 0x157   :  { %375 = vmatpush.msra.mxu3 %v880_v61 }
 0x15a   :  { %852 = vmatpush.xpose.msk.msrb.mxu0 %vm59_vm3, %v405_v62 }
 0x15d   :  { %v397_v3 = vpop.permute.xlu0 %396 }
 0x15e   :  { %853 = vmatpush.xpose.msk.msrb.mxu0 %vm59_vm3, %v403_v52 }
 0x162   :  { %854 = vmatpush.xpose.msk.msrb.mxu0 %vm59_vm3, %v401_v50 }
 0x166   :  { %855 = vmatpush.xpose.msk.msrb.mxu0 %vm59_vm3, %v399_v63 }
 0x169   :  { %856 = vmatmul.msk.f32.vlgmr.msrb.gmra.mxu0 %vm59_vm3, %v393_v55 }
 0x171   :  { %857 = vmatmul.msk.f32.gmra.mxu0 %vm59_vm3, %v395_v54 }
 0x175   :  { %v245_v1 = vpop.f32.mrf.mxu2 }
 0x176   :  { %v246_v2 = vadd.f32 %v245_v1, %v186_v0 }
 0x178   :  { %v255_v4 = vsel %vm254_vm4, %v246_v2, -inf }
 0x179   :  { %858 = vmatmul.msk.f32.gmra.mxu0 %vm59_vm3, %v397_v3  ;;  %256 = vmax.xlane.f32.xlu1 %v255_v4 }
 0x17d   :  { %v248_v8 = vpop.f32.mrf.mxu2 }
 0x17e   :  { %v249_v9 = vadd.f32 %v248_v8, %v187_v6 }
 0x180   :  { %v258_v10 = vsel %vm254_vm4, %v249_v9, -inf }
 0x181   :  { %259 = vmax.xlane.f32.xlu2 %v258_v10 }
 0x185   :  { %v251_v12 = vpop.f32.mrf.mxu2 }
 0x186   :  { %v252_v13 = vadd.f32 %v251_v12, %v188_v11 }
 0x188   :  { %v261_v15 = vsel %vm254_vm4, %v252_v13, -inf }
 0x189   :  { %262 = vmax.xlane.f32.xlu0 %v261_v15 }
 0x192   :  { %892 = vrot.lane.b32.xlu1 %v1180_v16, %s960_s3 }
 0x19a   :  { %897 = vrot.lane.b32.xlu1 %v1186_v18, %s960_s3 }
 0x19d   :  { %887 = vrot.lane.b32.xlu0 %v1103_v26, %s960_s3 }
 0x1a2   :  { %902 = vrot.lane.b32.xlu1 %v1122_v42, %s961_s8 }
 0x1e6   :  { %v461_v19 = vpop.f32.mrf.mxu0 }
 0x1e7   :  { %v462_v20 = vadd.f32 %v461_v19, %v186_v0 }
 0x1e9   :  { %v470_v21 = vsel %vm254_vm4, %v462_v20, -inf }
 0x1ea   :  { %471 = vmax.xlane.f32.xlu2 %v470_v21 }
 0x1ec   :  { %v257_v22 = vpop.xlane.xlu1 %256 }
 0x1ed   :  { %v264_v23 = vsub.f32 %v246_v2, %v257_v22 }
 0x1ee   :  { %v464_v24 = vpop.f32.mrf.mxu0 }
 0x1ef   :  { %v267_v17 = vmul.f32 1.442695, %v264_v23  ;;  %v465_v25 = vadd.f32 %v464_v24, %v187_v6 }
 0x1f1   :  { %929 = vpow2.f32 %v267_v17  ;;  %v473_v27 = vsel %vm254_vm4, %v465_v25, -inf }
 0x1f2   :  { %474 = vmax.xlane.f32.xlu1 %v473_v27 }
 0x1f4   :  { %v260_v28 = vpop.xlane.xlu2 %259 }
 0x1f5   :  { %v265_v29 = vsub.f32 %v249_v9, %v260_v28 }
 0x1f6   :  { %v467_v30 = vpop.f32.mrf.mxu0 }
 0x1f7   :  { %v1196_v31 = vpop.eup %929  ;;  %v269_v32 = vmul.f32 1.442695, %v265_v29  ;;  %v468_v33 = vadd.f32 %v467_v30, %v188_v11 }
 0x1f8   :  { %v273_v35 = vsel %vm254_vm4, %v1196_v31, 0.0 }
 0x1f9   :  { %931 = vpow2.f32 %v269_v32  ;;  %274 = vadd.xlane.f32.xlu0 %v273_v35  ;;  %v476_v36 = vsel %vm254_vm4, %v468_v33, -inf }
 0x1fa   :  { %477 = vmax.xlane.f32.xlu2 %v476_v36 }
 0x1fc   :  { %v263_v37 = vpop.xlane.xlu0 %262 }
 0x1fd   :  { %v266_v38 = vsub.f32 %v252_v13, %v263_v37 }
 0x1ff   :  { %v1201_v39 = vpop.eup %931  ;;  %v271_v40 = vmul.f32 1.442695, %v266_v38 }
 0x200   :  { %v276_v41 = vsel %vm254_vm4, %v1201_v39, 0.0 }
 0x201   :  { %933 = vpow2.f32 %v271_v40  ;;  %277 = vadd.xlane.f32.xlu0 %v276_v41 }
 0x204   :  { %v893_v42 = vpop.permute.xlu1 %892 }
 0x205   :  { %v894_v49 = vunpack.i.l.bf16 %v893_v42  ;;  %v895_v50 = vunpack.i.h.bf16 %v893_v42 }
 0x207   :  { %v1205_v43 = vpop.eup %933 }
 0x208   :  { %v279_v44 = vsel %vm254_vm4, %v1205_v43, 0.0 }
 0x209   :  { %280 = vadd.xlane.f32.xlu2 %v279_v44 }
 0x20b   :  { %907 = vrot.lane.b32.xlu1 %v1114_v34, %s961_s8 }
 0x20c   :  { %v898_v45 = vpop.permute.xlu1 %897 }
 0x20d   :  { %v899_v52 = vunpack.i.l.bf16 %v898_v45  ;;  %v900_v53 = vunpack.i.h.bf16 %v898_v45 }
 0x20f   :  { %v888_v46 = vpop.permute.xlu0 %887 }
 0x210   :  { %v889_v47 = vunpack.i.l.bf16 %v888_v46  ;;  %v890_v48 = vunpack.i.h.bf16 %v888_v46 }
 0x212   :  { %376 = vmatpush.msra.mxu3 %v889_v47 }
 0x214   :  { %377 = vmatpush.msra.mxu3 %v890_v48  ;;  %v903_v51 = vpop.permute.xlu1 %902 }
 0x215   :  { %v904_v54 = vunpack.i.l.bf16 %v903_v51  ;;  %v905_v55 = vunpack.i.h.bf16 %v903_v51 }
 0x216   :  { %378 = vmatpush.msra.mxu3 %v894_v49 }
 0x218   :  { %379 = vmatpush.msra.mxu3 %v895_v50 }
 0x21a   :  { %380 = vmatpush.msra.mxu3 %v899_v52 }
 0x21c   :  { %381 = vmatpush.msra.mxu3 %v900_v53 }
 0x21e   :  { %587 = vmatpush.msrb.mxu3 %v904_v54 }
 0x220   :  { %588 = vmatpush.msrb.mxu3 %v905_v55 }
 0x221   :  { %912 = vrot.lane.b32.xlu2 %v1103_v26, %s961_s8 }
 0x25d   :  { %v472_v34 = vpop.xlane.xlu2 %471 }
 0x25e   :  { %v479_v56 = vsub.f32 %v462_v20, %v472_v34 }
 0x260   :  { %v482_v57 = vmul.f32 1.442695, %v479_v56 }
 0x262   :  { %935 = vpow2.f32 %v482_v57 }
 0x265   :  { %v475_v58 = vpop.xlane.xlu1 %474 }
 0x266   :  { %v480_v59 = vsub.f32 %v465_v25, %v475_v58 }
 0x268   :  { %v1213_v60 = vpop.eup %935  ;;  %v484_v61 = vmul.f32 1.442695, %v480_v59 }
 0x269   :  { %v488_v62 = vsel %vm254_vm4, %v1213_v60, 0.0 }
 0x26a   :  { %937 = vpow2.f32 %v484_v61  ;;  %489 = vadd.xlane.f32.xlu0 %v488_v62 }
 0x26c   :  { %v275_v63 = vpop.xlane.xlu0 %274 }
 0x26d   :  { %939 = vrcp.f32 %v275_v63  ;;  %v478_v0 = vpop.xlane.xlu2 %477  ;;  %v293_v10 = vand.u32 2147483648, %v275_v63  ;;  %v291_v13 = vand.u32 2147483647, %v275_v63  ;;  %vm287_vm6 = vweird.f32 %v275_v63 }
 0x26e   :  { %v481_v1 = vsub.f32 %v468_v33, %v478_v0 }
 0x26f   :  { %v294_v21 = vor.u32 1.1754944e-38, %v293_v10  ;;  %vm292_vm8 = vcmp.eq.f32.partialorder %v291_v13, 8.507059e+37 }
 0x270   :  { %v1217_v2 = vpop.eup %937  ;;  %v486_v26 = vmul.f32 1.442695, %v481_v1 }
 0x271   :  { %v491_v3 = vsel %vm254_vm4, %v1217_v2, 0.0 }
 0x272   :  { %941 = vpow2.f32 %v486_v26  ;;  %492 = vadd.xlane.f32.xlu1 %v491_v3 }
 0x273   :  { %v940_v4 = vpop.eup %939 }
 0x274   :  { %v283_v6 = vmul.f32 %v940_v4, %v275_v63  ;;  %v278_v8 = vpop.xlane.xlu0 %277  ;;  %vm288_vm5 = vweird.f32 %v940_v4 }
 0x275   :  { %943 = vrcp.f32 %v278_v8  ;;  %vm289_vm7 = vmor %vm287_vm6, %vm288_vm5  ;;  %v308_v30 = vand.u32 2147483648, %v278_v8  ;;  %v306_v33 = vand.u32 2147483647, %v278_v8  ;;  %vm302_vm10 = vweird.f32 %v278_v8 }
 0x276   :  { %v284_v9 = vsub.f32 1.0, %v283_v6 }
 0x277   :  { %v309_v38 = vor.u32 1.1754944e-38, %v308_v30  ;;  %vm307_vm12 = vcmp.eq.f32.partialorder %v306_v33, 8.507059e+37 }
 0x278   :  { %v1221_v11 = vpop.eup %941  ;;  %v285_v12 = vmul.f32 %v940_v4, %v284_v9 }
 0x279   :  { %v494_v15 = vsel %vm254_vm4, %v1221_v11, 0.0 }
 0x27a   :  { %495 = vadd.xlane.f32.xlu2 %v494_v15  ;;  %v286_v19 = vadd.f32 %v940_v4, %v285_v12 }
 0x27b   :  { %v944_v20 = vpop.eup %943 }
 0x27c   :  { %v298_v22 = vmul.f32 %v944_v20, %v278_v8  ;;  %v281_v23 = vpop.xlane.xlu2 %280  ;;  %v290_v24 = vsel %vm289_vm7, %v940_v4, %v286_v19  ;;  %vm303_vm9 = vweird.f32 %v944_v20 }
 0x27d   :  { %945 = vrcp.f32 %v281_v23  ;;  %v908_v17 = vpop.permute.xlu1 %907  ;;  %v295_v25 = vsel %vm292_vm8, %v294_v21, %v290_v24  ;;  %vm304_vm11 = vmor %vm302_vm10, %vm303_vm9  ;;  %v323_v46 = vand.u32 2147483648, %v281_v23  ;;  %v321_v49 = vand.u32 2147483647, %v281_v23 }
 0x27e   :  { %v299_v27 = vsub.f32 1.0, %v298_v22  ;;  %917 = vrot.lane.b32.xlu0 %v1180_v16, %s961_s8  ;;  %v296_v28 = vmul.f32 %v1196_v31, %v295_v25  ;;  %v909_v29 = vunpack.i.l.bf16 %v908_v17  ;;  %v910_v35 = vunpack.i.h.bf16 %v908_v17 }
 0x27f   :  { %vm317_vm14 = vweird.f32 %v281_v23  ;;  %v324_v51 = vor.u32 1.1754944e-38, %v323_v46  ;;  %vm322_vm0 = vcmp.eq.f32.partialorder %v321_v49, 8.507059e+37 }
 0x280   :  { %v300_v32 = vmul.f32 %v944_v20, %v299_v27  ;;  %843 = vmatmul.msk.f32.vlgmr.msra.gmra.mxu3 %vm254_vm4, %v296_v28 }
 0x281   :  { %589 = vmatpush.msrb.mxu3 %v909_v29 }
 0x282   :  { %v301_v36 = vadd.f32 %v944_v20, %v300_v32 }
 0x283   :  { %v946_v37 = vpop.eup %945  ;;  %590 = vmatpush.msrb.mxu3 %v910_v35 }
 0x284   :  { %v313_v40 = vmul.f32 %v946_v37, %v281_v23  ;;  %v913_v41 = vpop.permute.xlu2 %912  ;;  %v305_v16 = vsel %vm304_vm11, %v944_v20, %v301_v36  ;;  %vm318_vm13 = vweird.f32 %v946_v37 }
 0x285   :  { %v914_v31 = vunpack.i.l.bf16 %v913_v41  ;;  %v310_v42 = vsel %vm307_vm12, %v309_v38, %v305_v16  ;;  %v915_v47 = vunpack.i.h.bf16 %v913_v41  ;;  %vm319_vm15 = vmor %vm317_vm14, %vm318_vm13  ;;  %v623_v41 = vld [vmem:[%s1324_s6 + $0x8] sm:$0x3] }
 0x286   :  { %v314_v44 = vsub.f32 1.0, %v313_v40  ;;  %922 = vrot.lane.b32.xlu0 %v1186_v18, %s961_s8  ;;  %v311_v45 = vmul.f32 %v1201_v39, %v310_v42 }
 0x287   :  { %591 = vmatpush.msrb.mxu3 %v914_v31 }
 0x288   :  { %v315_v48 = vmul.f32 %v946_v37, %v314_v44  ;;  %844 = vmatmul.msk.f32.gmra.mxu3 %vm254_vm4, %v311_v45 }
 0x289   :  { %592 = vmatpush.msrb.mxu3 %v915_v47 }
 0x28a   :  { %v316_v50 = vadd.f32 %v946_v37, %v315_v48 }
 0x28c   :  { %v320_v52 = vsel %vm319_vm15, %v946_v37, %v316_v50  ;;  %vm638_vm15 = vcmask 1041408  }
 0x28d   :  { %v325_v53 = vsel %vm322_vm0, %v324_v51, %v320_v52  ;;  %862 = vmatpush.msk.msrb.mxu2 %vm638_vm15, %v623_v41  ;;  %v928_v52 = vld [vmem:[%s1325_s7] ss:$0 sm:$0xff]  ;;  %vm674_vm0 = vcmask 195584  }
 0x28e   :  { %v326_v18 = vmul.f32 %v1205_v43, %v325_v53  ;;  %v802_v41 = vld [vmem:[%s1328_s11] sm:$0xff] }
 0x290   :  { %845 = vmatmul.msk.f32.gmra.mxu3 %vm254_vm4, %v326_v18 }
 0x2dd   :  { %v490_v39 = vpop.xlane.xlu0 %489 }
 0x2de   :  { %947 = vrcp.f32 %v490_v39  ;;  %v508_v43 = vand.u32 2147483648, %v490_v39  ;;  %vm502_vm2 = vweird.f32 %v490_v39  ;;  %v506_v4 = vand.u32 2147483647, %v490_v39 }
 0x2e0   :  { %v509_v10 = vor.u32 1.1754944e-38, %v508_v43  ;;  %vm507_vm6 = vcmp.eq.f32.partialorder %v506_v4, 8.507059e+37 }
 0x2e4   :  { %v948_v54 = vpop.eup %947 }
 0x2e5   :  { %v493_v55 = vpop.xlane.xlu1 %492  ;;  %v498_v34 = vmul.f32 %v948_v54, %v490_v39  ;;  %vm503_vm1 = vweird.f32 %v948_v54 }
 0x2e6   :  { %949 = vrcp.f32 %v493_v55  ;;  %vm504_vm5 = vmor %vm502_vm2, %vm503_vm1  ;;  %v523_v21 = vand.u32 2147483648, %v493_v55  ;;  %vm517_vm8 = vweird.f32 %v493_v55  ;;  %v521_v24 = vand.u32 2147483647, %v493_v55 }
 0x2e7   :  { %v499_v56 = vsub.f32 1.0, %v498_v34 }
 0x2e8   :  { %v524_v27 = vor.u32 1.1754944e-38, %v523_v21  ;;  %vm522_vm10 = vcmp.eq.f32.partialorder %v521_v24, 8.507059e+37 }
 0x2e9   :  { %v500_v59 = vmul.f32 %v948_v54, %v499_v56 }
 0x2eb   :  { %v501_v0 = vadd.f32 %v948_v54, %v500_v59 }
 0x2ec   :  { %v950_v57 = vpop.eup %949 }
 0x2ed   :  { %v496_v58 = vpop.xlane.xlu2 %495  ;;  %v513_v61 = vmul.f32 %v950_v57, %v493_v55  ;;  %v505_v9 = vsel %vm504_vm5, %v948_v54, %v501_v0  ;;  %vm518_vm7 = vweird.f32 %v950_v57 }
 0x2ee   :  { %951 = vrcp.f32 %v496_v58  ;;  %v510_v15 = vsel %vm507_vm6, %v509_v10, %v505_v9  ;;  %vm519_vm9 = vmor %vm517_vm8, %vm518_vm7  ;;  %v538_v30 = vand.u32 2147483648, %v496_v58  ;;  %vm532_vm12 = vweird.f32 %v496_v58 }
 0x2ef   :  { %v514_v1 = vsub.f32 1.0, %v513_v61  ;;  %v511_v23 = vmul.f32 %v1213_v60, %v510_v15  ;;  %v536_v33 = vand.u32 2147483647, %v496_v58 }
 0x2f0   :  { %v918_v62 = vpop.permute.xlu0 %917  ;;  %v539_v35 = vor.u32 1.1754944e-38, %v538_v30 }
 0x2f1   :  { %v919_v63 = vunpack.i.l.bf16 %v918_v62  ;;  %v920_v26 = vunpack.i.h.bf16 %v918_v62  ;;  %v515_v6 = vmul.f32 %v950_v57, %v514_v1  ;;  %vm537_vm14 = vcmp.eq.f32.partialorder %v536_v33, 8.507059e+37 }
 0x2f3   :  { %593 = vmatpush.msrb.mxu3 %v919_v63  ;;  %v516_v20 = vadd.f32 %v950_v57, %v515_v6 }
 0x2f4   :  { %v952_v3 = vpop.eup %951 }
 0x2f5   :  { %594 = vmatpush.msrb.mxu3 %v920_v26  ;;  %v528_v8 = vmul.f32 %v952_v3, %v496_v58  ;;  %v520_v25 = vsel %vm519_vm9, %v950_v57, %v516_v20  ;;  %vm533_vm11 = vweird.f32 %v952_v3  ;;  %v671_v57 = vld [vmem:[%s1326_s9] sm:$0xff]  ;;  %v672_v58 = vld [vmem:[%s1326_s9 + $0x8] sm:$0xff] }
 0x2f6   :  { %v525_v28 = vsel %vm522_vm10, %v524_v27, %v520_v25  ;;  %vm534_vm13 = vmor %vm532_vm12, %vm533_vm11 }
 0x2f7   :  { %v529_v19 = vsub.f32 1.0, %v528_v8  ;;  %v526_v32 = vmul.f32 %v1217_v2, %v525_v28 }
 0x2f8   :  { %v923_v12 = vpop.permute.xlu0 %922 }
 0x2f9   :  { %v924_v13 = vunpack.i.l.bf16 %v923_v12  ;;  %v925_v22 = vunpack.i.h.bf16 %v923_v12  ;;  %v530_v17 = vmul.f32 %v952_v3, %v529_v19 }
 0x2fb   :  { %595 = vmatpush.msrb.mxu3 %v924_v13  ;;  %v531_v29 = vadd.f32 %v952_v3, %v530_v17 }
 0x2fd   :  { %596 = vmatpush.msrb.mxu3 %v925_v22  ;;  %v535_v60 = vsel %vm534_vm13, %v952_v3, %v531_v29 }
 0x2fe   :  { %859 = vmatmul.msk.f32.vlgmr.msrb.gmra.mxu3 %vm254_vm4, %v511_v23  ;;  %v540_v36 = vsel %vm537_vm14, %v539_v35, %v535_v60 }
 0x2ff   :  { %v541_v37 = vmul.f32 %v1221_v11, %v540_v36  ;;  %v622_v11 = vld [vmem:[%s1324_s6] sm:$0xff] }
 0x300   :  { %657 = vmatpush.msrb.mxu2 %v622_v11  ;;  %v796_v36 = vld [vmem:[%s1327_s10] sm:$0xff] }
 0x303   :  { %v383_v38 = vpop.f32.mrf.mxu3 }
 0x306   :  { %860 = vmatmul.msk.f32.gmra.mxu3 %vm254_vm4, %v526_v32 }
 0x30b   :  { %v386_v40 = vpop.f32.mrf.mxu3 }
 0x30e   :  { %861 = vmatmul.msk.f32.gmra.mxu3 %vm254_vm4, %v541_v37  ;;  %vm628_vm4 = vcmask 80896  }
 0x313   :  { %v389_v2 = vpop.f32.mrf.mxu3 }
 0x381   :  { %v598_v16 = vpop.f32.mrf.mxu3 }
 0x382   :  { %610 = vrot.lane.b32.xlu1 %v598_v16, %s962_s21 }
 0x389   :  { %v601_v31 = vpop.f32.mrf.mxu3 }
 0x38a   :  { %612 = vrot.lane.b32.xlu0 %v601_v31, %s962_s21 }
 0x391   :  { %v604_v42 = vpop.f32.mrf.mxu3 }
 0x392   :  { %614 = vrot.lane.b32.xlu0 %v604_v42, %s962_s21 }
 0x3f4   :  { %v611_v44 = vpop.permute.xlu1 %610 }
 0x3f5   :  { %v619_v45 = vsel %vm59_vm3, %v383_v38, %v611_v44 }
 0x3f6   :  { %863 = vmatmul.msk.f32.vlgmr.msrb.gmra.mxu2 %vm628_vm4, %v619_v45 }
 0x3fc   :  { %v613_v46 = vpop.permute.xlu0 %612 }
 0x3fd   :  { %v620_v47 = vsel %vm59_vm3, %v386_v40, %v613_v46  ;;  %v797_v46 = vld [vmem:[%s1327_s10 + $0x8] sm:$0xff] }
 0x3fe   :  { %864 = vmatmul.msk.f32.gmra.mxu2 %vm628_vm4, %v620_v47 }
 0x404   :  { %v615_v48 = vpop.permute.xlu0 %614 }
 0x405   :  { %v621_v49 = vsel %vm59_vm3, %v389_v2, %v615_v48 }
 0x406   :  { %865 = vmatmul.msk.f32.gmra.mxu2 %vm628_vm4, %v621_v49 }
 0x479   :  { %v659_v50 = vpop.f32.mrf.mxu2 }
 0x47a   :  { %v660_v54 = vadd.f32 %v928_v52, %v659_v50  ;;  %v803_v50 = vld [vmem:[%s1328_s11 + $0x8] sm:$0xff] }
 0x47c   :  { %v668_v56 = vadd.f32 %v660_v54, %v1049_v5  ;;  %v798_v54 = vld [vmem:[%s1327_s10 + $0x10] sm:$0xff] }
 0x481   :  { %v662_v51 = vpop.f32.mrf.mxu2 }
 0x482   :  { %v663_v18 = vadd.f32 %v928_v52, %v662_v51 }
 0x484   :  { %v669_v34 = vadd.f32 %v663_v18, %v1060_v7  ;;  %v673_v7 = vld [vmem:[%s1326_s9 + $0x10] sm:$0xff] }
 0x489   :  { %v665_v53 = vpop.f32.mrf.mxu2 }
 0x48a   :  { %v666_v39 = vadd.f32 %v928_v52, %v665_v53 }
 0x48c   :  { %v670_v55 = vadd.f32 %v666_v39, %v1091_v14 }
 0x48e   :  { %697 = vmatpush.msra.mxu0 %v670_v55 }
 0x490   :  { %698 = vmatpush.msra.mxu0 %v669_v34 }
 0x492   :  { %699 = vmatpush.msra.mxu0 %v668_v56 }
 0x493   :  { %866 = vmatmul.msk.f32.vlgmr.msra.gmra.mxu0 %vm674_vm0, %v671_v57 }
 0x49b   :  { %867 = vmatmul.msk.f32.gmra.mxu0 %vm674_vm0, %v672_v58 }
 0x4a3   :  { %868 = vmatmul.msk.f32.gmra.mxu0 %vm674_vm0, %v673_v7 }
 0x510   :  { %v701_v5 = vpop.f32.mrf.mxu0 }
 0x511   :  { %v710_v14 = vsel %vm59_vm3, %v701_v5, 0.0 }
 0x512   :  { %711 = vadd.xlane.f32.xlu2 %v710_v14 }
 0x518   :  { %v704_v59 = vpop.f32.mrf.mxu0 }
 0x519   :  { %v713_v61 = vsel %vm59_vm3, %v704_v59, 0.0 }
 0x51a   :  { %714 = vadd.xlane.f32.xlu1 %v713_v61 }
 0x520   :  { %v707_v62 = vpop.f32.mrf.mxu0 }
 0x521   :  { %v716_v63 = vsel %vm59_vm3, %v707_v62, 0.0 }
 0x522   :  { %717 = vadd.xlane.f32.xlu0 %v716_v63 }
 0x585   :  { %v712_v1 = vpop.xlane.xlu2 %711 }
 0x586   :  { %v719_v4 = vsub.f32 %v668_v56, %v712_v1  ;;  %v804_v56 = vld [vmem:[%s1328_s11 + $0x10] sm:$0xff] }
 0x588   :  { %v722_v9 = vmul.f32 %v719_v4, %v719_v4 }
 0x58d   :  { %v715_v0 = vpop.xlane.xlu1 %714 }
 0x58e   :  { %v1271_v26 = vsub.f32 %v669_v34, %v715_v0 }
 0x590   :  { %v723_v8 = vmul.f32 %v1271_v26, %v1271_v26 }
 0x595   :  { %v718_v43 = vpop.xlane.xlu0 %717 }
 0x596   :  { %v1273_v3 = vsub.f32 %v670_v55, %v718_v43 }
 0x598   :  { %v724_v6 = vmul.f32 %v1273_v3, %v1273_v3 }
 0x59a   :  { %738 = vmatpush.msra.mxu3 %v724_v6 }
 0x59c   :  { %739 = vmatpush.msra.mxu3 %v723_v8 }
 0x59e   :  { %740 = vmatpush.msra.mxu3 %v722_v9 }
 0x59f   :  { %869 = vmatmul.msk.f32.vlgmr.msra.gmra.mxu3 %vm674_vm0, %v671_v57 }
 0x5a7   :  { %870 = vmatmul.msk.f32.gmra.mxu3 %vm674_vm0, %v672_v58 }
 0x5af   :  { %871 = vmatmul.msk.f32.gmra.mxu3 %vm674_vm0, %v673_v7 }
 0x622   :  { %v742_v10 = vpop.f32.mrf.mxu3 }
 0x623   :  { %v751_v12 = vsel %vm59_vm3, %v742_v10, 0.0 }
 0x624   :  { %752 = vadd.xlane.f32.xlu2 %v751_v12 }
 0x62a   :  { %v745_v13 = vpop.f32.mrf.mxu3 }
 0x62b   :  { %v754_v15 = vsel %vm59_vm3, %v745_v13, 0.0 }
 0x62c   :  { %755 = vadd.xlane.f32.xlu2 %v754_v15 }
 0x632   :  { %v748_v19 = vpop.f32.mrf.mxu3 }
 0x633   :  { %v757_v20 = vsel %vm59_vm3, %v748_v19, 0.0 }
 0x634   :  { %758 = vadd.xlane.f32.xlu2 %v757_v20 }
 0x697   :  { %v753_v21 = vpop.xlane.xlu2 %752 }
 0x698   :  { %v760_v22 = vadd.f32 1e-05, %v753_v21 }
 0x69a   :  { %953 = vrsqrt.f32 %v760_v22  ;;  %vm769_vm2 = vweird.f32 %v760_v22 }
 0x69f   :  { %v756_v23 = vpop.xlane.xlu2 %755 }
 0x6a0   :  { %v954_v24 = vpop.eup %953  ;;  %v761_v17 = vadd.f32 1e-05, %v756_v23 }
 0x6a1   :  { %v764_v25 = vmul.f32 %v954_v24, %v760_v22  ;;  %vm770_vm1 = vweird.f32 %v954_v24 }
 0x6a2   :  { %955 = vrsqrt.f32 %v761_v17  ;;  %vm771_vm5 = vmor %vm769_vm2, %vm770_vm1  ;;  %vm779_vm7 = vweird.f32 %v761_v17 }
 0x6a3   :  { %v765_v27 = vmul.f32 %v954_v24, %v764_v25 }
 0x6a5   :  { %v766_v28 = vmul.f32 0.5, %v765_v27 }
 0x6a7   :  { %v767_v29 = vsub.f32 1.5, %v766_v28  ;;  %v759_v30 = vpop.xlane.xlu2 %758 }
 0x6a8   :  { %v956_v32 = vpop.eup %955  ;;  %v762_v33 = vadd.f32 1e-05, %v759_v30 }
 0x6a9   :  { %v768_v60 = vmul.f32 %v954_v24, %v767_v29  ;;  %v774_v35 = vmul.f32 %v956_v32, %v761_v17  ;;  %vm780_vm6 = vweird.f32 %v956_v32 }
 0x6aa   :  { %957 = vrsqrt.f32 %v762_v33  ;;  %vm781_vm8 = vmor %vm779_vm7, %vm780_vm6  ;;  %vm789_vm10 = vweird.f32 %v762_v33 }
 0x6ab   :  { %v772_v37 = vsel %vm771_vm5, %v954_v24, %v768_v60  ;;  %v775_v38 = vmul.f32 %v956_v32, %v774_v35 }
 0x6ac   :  { %v793_v40 = vmul.f32 %v772_v37, %v719_v4 }
 0x6ad   :  { %v776_v2 = vmul.f32 0.5, %v775_v38 }
 0x6ae   :  { %v799_v16 = vmul.f32 %v796_v36, %v793_v40 }
 0x6af   :  { %v777_v31 = vsub.f32 1.5, %v776_v2 }
 0x6b0   :  { %v958_v42 = vpop.eup %957  ;;  %v805_v11 = vadd.f32 %v802_v41, %v799_v16 }
 0x6b1   :  { %v778_v44 = vmul.f32 %v956_v32, %v777_v31  ;;  %v784_v45 = vmul.f32 %v958_v42, %v762_v33  ;;  %vm790_vm9 = vweird.f32 %v958_v42 }
 0x6b2   :  { %808 = vst.msk [vmem:[%s1329_s12] sm:$0xff] %vm59_vm3, %v805_v11  ;;  %vm791_vm11 = vmor %vm789_vm10, %vm790_vm9 }
 0x6b3   :  { %v782_v47 = vsel %vm781_vm8, %v956_v32, %v778_v44  ;;  %v785_v48 = vmul.f32 %v958_v42, %v784_v45 }
 0x6b4   :  { %v794_v49 = vmul.f32 %v782_v47, %v1271_v26 }
 0x6b5   :  { %v786_v51 = vmul.f32 0.5, %v785_v48 }
 0x6b6   :  { %v800_v52 = vmul.f32 %v797_v46, %v794_v49 }
 0x6b7   :  { %v787_v53 = vsub.f32 1.5, %v786_v51 }
 0x6b8   :  { %v806_v18 = vadd.f32 %v803_v50, %v800_v52 }
 0x6b9   :  { %v788_v39 = vmul.f32 %v958_v42, %v787_v53 }
 0x6ba   :  { %809 = vst.msk [vmem:[%s1329_s12 + $0x8] sm:$0xff] %vm59_vm3, %v806_v18 }
 0x6bb   :  { %v792_v55 = vsel %vm791_vm11, %v958_v42, %v788_v39 }
 0x6bc   :  { %v795_v34 = vmul.f32 %v792_v55, %v1273_v3 }
 0x6be   :  { %v801_v57 = vmul.f32 %v798_v54, %v795_v34 }
 0x6c0   :  { %v807_v58 = vadd.f32 %v804_v56, %v801_v57 }
 0x6c2   :  { %810 = vst.msk [vmem:[%s1329_s12 + $0x10] sm:$0xff] %vm59_vm3, %v807_v58 }

</bundles_post_ra>
